<compile_context>
chip_gen: v7x
topology: tpu7x:2x2x1
jax: 0.10.0
libtpu: 0.0.40
codegen_flags: <defaults>
</compile_context>

<pallas_src>
import functools

import jax
import jax.numpy as jnp
from jax import lax
from jax.experimental import pallas as pl
from jax.experimental.pallas import tpu as pltpu

D_MODEL = 32
DROPOUT_P = 0.1
LANES = 128

# Packed-row tile size (rows of 128 lanes = 4 original rows each, f32 => 512 B per packed row).
#   v5e  (16 MiB scoped VMEM default): TILE_ROWS <= ~4096 keeps x/out/bits double-buffers < ~12 MiB.
#   v6e  (32/128 MiB): sweep {1024, 2048, 4096, 8192}; optionally pipeline_mode=pl.Buffered(3).
#   v7x  (64 MiB total VMEM, 2 TCs): keep TILE_ROWS ~2048 and the grid length >= 2 so both cores run.
DEFAULT_TILE_ROWS = 2048


def _round_up(a, m):
    return (a + m - 1) // m * m


def _sublayer_connection_kernel(x_ref, segsum_ref, gamma_ref, beta_ref, wblk_ref, b_ref,
                                *rest, eps, p, dropout, d):
    if dropout:
        bits_ref, o_ref = rest
    else:
        (o_ref,) = rest

    x = x_ref[...].astype(jnp.float32)      # (TILE, 128): 128//d original rows per lane-row
    segsum = segsum_ref[...]                # (128, 128) block-diag of ones: per-segment sum + broadcast

    hi = lax.Precision.HIGHEST              # exact f32 MXU passes; MXU has slack (kernel is HBM-bound)

    # ---- LayerNorm per d-lane segment (torch: unbiased std, eps added to std) ----
    mean = jnp.dot(x, segsum, precision=hi, preferred_element_type=jnp.float32) * jnp.float32(1.0 / d)
    diff = x - mean
    ssq = jnp.dot(diff * diff, segsum, precision=hi, preferred_element_type=jnp.float32)
    std = jnp.sqrt(ssq * jnp.float32(1.0 / (d - 1)))
    # One divide per element; cheap next to the HBM stream and keeps exact torch eps-on-std numerics.
    inv = jnp.float32(1.0) / (std + jnp.float32(eps))
    normed = gamma_ref[...] * diff * inv + beta_ref[...]

    # ---- sublayer: Linear(d, d) applied to all packed rows via the block-diagonal weight ----
    y = jnp.dot(normed, wblk_ref[...], precision=hi, preferred_element_type=jnp.float32) + b_ref[...]

    # ---- inverted dropout: raw uint32 threshold compare, scale folded into one select+mul ----
    if dropout:
        thresh = jnp.uint32(min(int(round(p * (1 << 32))), (1 << 32) - 1))
        keep = bits_ref[...] >= thresh
        y = jnp.where(keep, y * jnp.float32(1.0 / (1.0 - p)), jnp.float32(0.0))

    # ---- residual ----
    o_ref[...] = (x + y).astype(o_ref.dtype)


@functools.partial(jax.jit, static_argnames=("eps", "p", "training", "tile_rows"))
def sublayer_connection(x, gamma, beta, w, b, key=None, *, eps=1e-6, p=DROPOUT_P,
                        training=False, tile_rows=DEFAULT_TILE_ROWS):
    B, S, D = x.shape
    if LANES % D != 0:
        raise NotImplementedError("lane-dense packing requires 128 % d_model == 0")
    P = LANES // D                       # original rows packed per 128-lane row
    N = B * S
    use_dropout = bool(training) and p > 0.0

    # ---- lane-dense packing (free row-major reshape) + tiling over packed rows ----
    R = _round_up(N, P) // P             # packed rows before tile padding
    tile = min(_round_up(int(tile_rows), 8), _round_up(R, 8))
    Rp = _round_up(R, tile)
    grid = Rp // tile

    xf = x.reshape(N, D)
    pad = Rp * P - N
    if pad:
        xf = jnp.pad(xf, ((0, pad), (0, 0)))     # zero rows are benign (eps keeps 0/eps finite)
    xp = xf.reshape(Rp, LANES)

    f32 = jnp.float32
    eyeP = jnp.eye(P, dtype=f32)
    w_blk = jnp.kron(eyeP, w.astype(f32))                    # (128,128) block-diagonal Linear weight
    seg_sum = jnp.kron(eyeP, jnp.ones((D, D), f32))          # (128,128) per-segment sum + broadcast
    gamma_p = jnp.tile(gamma.astype(f32), P).reshape(1, LANES)
    beta_p = jnp.tile(beta.astype(f32), P).reshape(1, LANES)
    b_p = jnp.tile(b.astype(f32), P).reshape(1, LANES)

    row_spec = pl.BlockSpec((tile, LANES), lambda i: (i, 0))          # streamed / double-buffered
    mat_spec = pl.BlockSpec((LANES, LANES), lambda i: (0, 0))         # resident across the grid
    vec_spec = pl.BlockSpec((1, LANES), lambda i: (0, 0))

    in_specs = [row_spec, mat_spec, vec_spec, vec_spec, mat_spec, vec_spec]
    args = [xp, seg_sum, gamma_p, beta_p, w_blk, b_p]
    if use_dropout:
        if key is None:
            raise ValueError("training=True with p>0 requires a PRNG key")
        # Independent bits for every element => no dropout-mask reuse across grid steps.
        bits = jax.random.bits(key, (Rp, LANES), dtype=jnp.uint32)
        in_specs.append(row_spec)
        args.append(bits)

    kernel = functools.partial(_sublayer_connection_kernel, eps=float(eps), p=float(p),
                               dropout=use_dropout, d=D)

    cost = pl.CostEstimate(
        flops=int(Rp * (3 * 2 * LANES * LANES + 12 * LANES)),
        transcendentals=int(Rp * LANES),
        bytes_accessed=int((2 + int(use_dropout)) * Rp * LANES * 4 + 2 * LANES * LANES * 4),
    )

    out = pl.pallas_call(
        kernel,
        out_shape=jax.ShapeDtypeStruct((Rp, LANES), x.dtype),
        grid=(grid,),
        in_specs=in_specs,
        out_specs=row_spec,
        compiler_params=pltpu.CompilerParams(dimension_semantics=("parallel",)),
        cost_estimate=cost,
    )(*args)

    return out.reshape(Rp * P, D)[:N].reshape(B, S, D)


def _reference_norm_linear(x, gamma, beta, w, b, eps):
    mean = jnp.mean(x, axis=-1, keepdims=True)
    var_unbiased = jnp.sum((x - mean) ** 2, axis=-1, keepdims=True) / (x.shape[-1] - 1)
    std = jnp.sqrt(var_unbiased)
    normed = gamma * (x - mean) / (std + eps) + beta
    return normed @ w + b


if __name__ == "__main__":
    root = jax.random.PRNGKey(0)
    kx, kg, kbeta, kw, kb, kx2, kdrop = jax.random.split(root, 7)

    B, S, D = 2, 8, D_MODEL
    x = jax.random.normal(kx, (B, S, D), dtype=jnp.float32)
    gamma = 1.0 + 0.1 * jax.random.normal(kg, (D,), dtype=jnp.float32)
    beta = 0.05 * jax.random.normal(kbeta, (D,), dtype=jnp.float32)
    w = jax.random.normal(kw, (D, D), dtype=jnp.float32) / jnp.sqrt(jnp.float32(D))
    b = 0.02 * jax.random.normal(kb, (D,), dtype=jnp.float32)

    # 1) Eval mode (dropout == identity), tiny shape -> single tile.
    out_eval = jax.block_until_ready(
        sublayer_connection(x, gamma, beta, w, b, training=False, eps=1e-6, p=DROPOUT_P))
    ref_eval = x + _reference_norm_linear(x, gamma, beta, w, b, 1e-6)
    assert out_eval.shape == (B, S, D)
    assert jnp.allclose(out_eval, ref_eval, atol=2e-4, rtol=2e-4), "eval mismatch vs reference"

    # 2) Eval mode, larger shape with a small tile -> multi-step parallel grid (pipelined path).
    B2, S2 = 2, 256
    x2 = jax.random.normal(kx2, (B2, S2, D), dtype=jnp.float32)
    out_eval2 = jax.block_until_ready(
        sublayer_connection(x2, gamma, beta, w, b, training=False, eps=1e-6, p=DROPOUT_P,
                            tile_rows=32))
    ref_eval2 = x2 + _reference_norm_linear(x2, gamma, beta, w, b, 1e-6)
    assert jnp.allclose(out_eval2, ref_eval2, atol=2e-4, rtol=2e-4), "tiled eval mismatch vs reference"

    # 3) Train mode: each element must equal x (dropped) or x + y/(1-p) (kept); drop fraction ~ p.
    out_train = jax.block_until_ready(
        sublayer_connection(x2, gamma, beta, w, b, kdrop, training=True, eps=1e-6, p=DROPOUT_P,
                            tile_rows=32))
    y_ref2 = _reference_norm_linear(x2, gamma, beta, w, b, 1e-6)
    kept_ref = x2 + y_ref2 / (1.0 - DROPOUT_P)
    is_drop = jnp.abs(out_train - x2) <= 1e-5
    is_keep = jnp.abs(out_train - kept_ref) <= 1e-3 * (1.0 + jnp.abs(kept_ref))
    assert out_train.shape == x2.shape
    assert bool(jnp.all(is_drop | is_keep)), "train output not consistent with inverted dropout"
    drop_frac = float(jnp.mean(is_drop.astype(jnp.float32)))
    assert 0.02 <= drop_frac <= 0.30, f"drop fraction {drop_frac} inconsistent with p={DROPOUT_P}"

    print("KERNEL_OK")
</pallas_src>

<mosaic_0001>
module attributes {stable_mosaic.version = 11 : i64} {
  func.func @_sublayer_connection_kernel(%arg0: i32, %arg1: memref<8x128xf32, #tpu.memory_space<vmem>>, %arg2: memref<128x128xf32, #tpu.memory_space<vmem>>, %arg3: memref<1x128xf32, #tpu.memory_space<vmem>>, %arg4: memref<1x128xf32, #tpu.memory_space<vmem>>, %arg5: memref<128x128xf32, #tpu.memory_space<vmem>>, %arg6: memref<1x128xf32, #tpu.memory_space<vmem>>, %arg7: memref<8x128xf32, #tpu.memory_space<vmem>>) attributes {dimension_semantics = [#tpu.dimension_semantics<parallel>], iteration_bounds = array<i64: 1>, scalar_prefetch = 0 : i64, scratch_operands = 0 : i64, tpu.core_type = #tpu.core_type<tc>, window_params = [{transform_indices = @transform_0, window_bounds = array<i64: 8, 128>}, {pipeline_mode = #tpu.pipeline_mode<synchronous>, transform_indices = @transform_1, window_bounds = array<i64: 128, 128>}, {pipeline_mode = #tpu.pipeline_mode<synchronous>, transform_indices = @transform_2, window_bounds = array<i64: 1, 128>}, {pipeline_mode = #tpu.pipeline_mode<synchronous>, transform_indices = @transform_3, window_bounds = array<i64: 1, 128>}, {pipeline_mode = #tpu.pipeline_mode<synchronous>, transform_indices = @transform_4, window_bounds = array<i64: 128, 128>}, {pipeline_mode = #tpu.pipeline_mode<synchronous>, transform_indices = @transform_5, window_bounds = array<i64: 1, 128>}, {transform_indices = @transform_6, window_bounds = array<i64: 8, 128>}]} {
    %c0 = arith.constant 0 : index
    %c0_0 = arith.constant 0 : index
    %0 = vector.load %arg1[%c0, %c0_0] : memref<8x128xf32, #tpu.memory_space<vmem>>, vector<8x128xf32>
    %c0_1 = arith.constant 0 : index
    %c0_2 = arith.constant 0 : index
    %1 = vector.load %arg2[%c0_1, %c0_2] : memref<128x128xf32, #tpu.memory_space<vmem>>, vector<128x128xf32>
    %cst = arith.constant dense<0.000000e+00> : vector<8x128xf32>
    %2 = tpu.matmul %0, %1, %cst {dimension_numbers = #tpu.dot_dimension_numbers<[1], [0], [0], [1], [0, 0, 1, 1], [], []>, precision = #tpu.contract_precision<fp32>} : vector<8x128xf32>, vector<128x128xf32>, vector<8x128xf32> -> vector<8x128xf32>
    %cst_3 = arith.constant 3.125000e-02 : f32
    %3 = vector.broadcast %cst_3 : f32 to vector<8x128xf32>
    %4 = arith.mulf %2, %3 : vector<8x128xf32>
    %5 = arith.subf %0, %4 : vector<8x128xf32>
    %6 = arith.mulf %5, %5 : vector<8x128xf32>
    %cst_4 = arith.constant dense<0.000000e+00> : vector<8x128xf32>
    %7 = tpu.matmul %6, %1, %cst_4 {dimension_numbers = #tpu.dot_dimension_numbers<[1], [0], [0], [1], [0, 0, 1, 1], [], []>, precision = #tpu.contract_precision<fp32>} : vector<8x128xf32>, vector<128x128xf32>, vector<8x128xf32> -> vector<8x128xf32>
    %cst_5 = arith.constant 0.0322580636 : f32
    %8 = vector.broadcast %cst_5 : f32 to vector<8x128xf32>
    %9 = arith.mulf %7, %8 : vector<8x128xf32>
    %10 = math.sqrt %9 : vector<8x128xf32>
    %cst_6 = arith.constant 9.99999997E-7 : f32
    %11 = vector.broadcast %cst_6 : f32 to vector<8x128xf32>
    %12 = arith.addf %10, %11 : vector<8x128xf32>
    %cst_7 = arith.constant 1.000000e+00 : f32
    %13 = vector.broadcast %cst_7 : f32 to vector<8x128xf32>
    %14 = arith.divf %13, %12 : vector<8x128xf32>
    %c0_8 = arith.constant 0 : index
    %c0_9 = arith.constant 0 : index
    %15 = vector.load %arg3[%c0_8, %c0_9] : memref<1x128xf32, #tpu.memory_space<vmem>>, vector<1x128xf32>
    %16 = vector.broadcast %15 : vector<1x128xf32> to vector<8x128xf32>
    %17 = arith.mulf %16, %5 : vector<8x128xf32>
    %18 = arith.mulf %17, %14 : vector<8x128xf32>
    %c0_10 = arith.constant 0 : index
    %c0_11 = arith.constant 0 : index
    %19 = vector.load %arg4[%c0_10, %c0_11] : memref<1x128xf32, #tpu.memory_space<vmem>>, vector<1x128xf32>
    %20 = vector.broadcast %19 : vector<1x128xf32> to vector<8x128xf32>
    %21 = arith.addf %18, %20 : vector<8x128xf32>
    %c0_12 = arith.constant 0 : index
    %c0_13 = arith.constant 0 : index
    %22 = vector.load %arg5[%c0_12, %c0_13] : memref<128x128xf32, #tpu.memory_space<vmem>>, vector<128x128xf32>
    %cst_14 = arith.constant dense<0.000000e+00> : vector<8x128xf32>
    %23 = tpu.matmul %21, %22, %cst_14 {dimension_numbers = #tpu.dot_dimension_numbers<[1], [0], [0], [1], [0, 0, 1, 1], [], []>, precision = #tpu.contract_precision<fp32>} : vector<8x128xf32>, vector<128x128xf32>, vector<8x128xf32> -> vector<8x128xf32>
    %c0_15 = arith.constant 0 : index
    %c0_16 = arith.constant 0 : index
    %24 = vector.load %arg6[%c0_15, %c0_16] : memref<1x128xf32, #tpu.memory_space<vmem>>, vector<1x128xf32>
    %25 = vector.broadcast %24 : vector<1x128xf32> to vector<8x128xf32>
    %26 = arith.addf %23, %25 : vector<8x128xf32>
    %27 = arith.addf %0, %26 : vector<8x128xf32>
    %c0_17 = arith.constant 0 : index
    %c0_18 = arith.constant 0 : index
    %28 = vector.load %arg7[%c0_17, %c0_18] : memref<8x128xf32, #tpu.memory_space<vmem>>, vector<8x128xf32>
    tpu.vector_store %arg7[%c0_17, %c0_18], %27 {strides = array<i32>} : memref<8x128xf32, #tpu.memory_space<vmem>>, vector<8x128xf32>,
    return
  }
  func.func @transform_0(%arg0: i32) -> (i32, i32) {
    %c0_i32 = arith.constant 0 : i32
    %c0_i32_0 = arith.constant 0 : i32
    return %arg0, %c0_i32 : i32, i32
  }
  func.func @transform_1(%arg0: i32) -> (i32, i32) {
    %c0_i32 = arith.constant 0 : i32
    %c0_i32_0 = arith.constant 0 : i32
    %c0_i32_1 = arith.constant 0 : i32
    return %c0_i32, %c0_i32_0 : i32, i32
  }
  func.func @transform_2(%arg0: i32) -> (i32, i32) {
    %c0_i32 = arith.constant 0 : i32
    %c0_i32_0 = arith.constant 0 : i32
    %c0_i32_1 = arith.constant 0 : i32
    return %c0_i32, %c0_i32_0 : i32, i32
  }
  func.func @transform_3(%arg0: i32) -> (i32, i32) {
    %c0_i32 = arith.constant 0 : i32
    %c0_i32_0 = arith.constant 0 : i32
    %c0_i32_1 = arith.constant 0 : i32
    return %c0_i32, %c0_i32_0 : i32, i32
  }
  func.func @transform_4(%arg0: i32) -> (i32, i32) {
    %c0_i32 = arith.constant 0 : i32
    %c0_i32_0 = arith.constant 0 : i32
    %c0_i32_1 = arith.constant 0 : i32
    return %c0_i32, %c0_i32_0 : i32, i32
  }
  func.func @transform_5(%arg0: i32) -> (i32, i32) {
    %c0_i32 = arith.constant 0 : i32
    %c0_i32_0 = arith.constant 0 : i32
    %c0_i32_1 = arith.constant 0 : i32
    return %c0_i32, %c0_i32_0 : i32, i32
  }
  func.func @transform_6(%arg0: i32) -> (i32, i32) {
    %c0_i32 = arith.constant 0 : i32
    %c0_i32_0 = arith.constant 0 : i32
    return %arg0, %c0_i32 : i32, i32
  }
}

</mosaic_0001>

<bundles_post_ra>
// kernel: mul.22
= control target key start
LH: loop header
LB: loop body
LE: loop exit
PB: predicated region body
PF: predicated region fallthrough
CT: control target
= control target key end

     0   :  { %s364_s0 = inlined_call_operand.vmem [shape: f32[128,128], index: 0, kind: input, shape index: {}]   ;;  %s365_s1 = inlined_call_operand.vmem [shape: f32[128,128], index: 1, kind: input, shape index: {}]   ;;  %s366_s2 = inlined_call_operand.vmem [shape: f32[128,128], index: 2, kind: output, shape index: {}]  }
   0x1   :  { %v3_v0 = vld [vmem:[%s364_s0] sm:$0xff]  ;;  %v160_v2 = vld [vmem:[%s364_s0 + $0x8] sm:$0xff]  ;;  %v163_v5 = vld [vmem:[%s364_s0 + $0x10] sm:$0xff] }
   0x2   :  { %v4_v1 = vld [vmem:[%s365_s1] sm:$0xff]  ;;  %v161_v4 = vld [vmem:[%s365_s1 + $0x8] sm:$0xff]  ;;  %v164_v6 = vld [vmem:[%s365_s1 + $0x10] sm:$0xff] }
   0x3   :  { %v7_v3 = vmul.f32 %v4_v1, %v3_v0  ;;  %v16_v7 = vmul.f32 %v161_v4, %v160_v2  ;;  %v26_v8 = vmul.f32 %v164_v6, %v163_v5  ;;  %v166_v9 = vld [vmem:[%s364_s0 + $0x18] sm:$0xff]  ;;  %v169_v11 = vld [vmem:[%s364_s0 + $0x20] sm:$0xff]  ;;  %v172_v14 = vld [vmem:[%s364_s0 + $0x28] sm:$0xff] }
   0x4   :  { %v167_v10 = vld [vmem:[%s365_s1 + $0x18] sm:$0xff]  ;;  %v170_v13 = vld [vmem:[%s365_s1 + $0x20] sm:$0xff]  ;;  %v173_v15 = vld [vmem:[%s365_s1 + $0x28] sm:$0xff] }
   0x5   :  { %9 = vst [vmem:[%s366_s2] sm:$0xff] %v7_v3  ;;  %v36_v12 = vmul.f32 %v167_v10, %v166_v9  ;;  %162 = vst [vmem:[%s366_s2 + $0x8] sm:$0xff] %v16_v7  ;;  %v46_v16 = vmul.f32 %v170_v13, %v169_v11  ;;  %v56_v17 = vmul.f32 %v173_v15, %v172_v14  ;;  %v175_v18 = vld [vmem:[%s364_s0 + $0x30] sm:$0xff]  ;;  %v178_v20 = vld [vmem:[%s364_s0 + $0x38] sm:$0xff] }
   0x6   :  { %165 = vst [vmem:[%s366_s2 + $0x10] sm:$0xff] %v26_v8  ;;  %v176_v19 = vld [vmem:[%s365_s1 + $0x30] sm:$0xff]  ;;  %v179_v22 = vld [vmem:[%s365_s1 + $0x38] sm:$0xff]  ;;  %v181_v23 = vld [vmem:[%s364_s0 + $0x40] sm:$0xff] }
   0x7   :  { %168 = vst [vmem:[%s366_s2 + $0x18] sm:$0xff] %v36_v12  ;;  %v66_v21 = vmul.f32 %v176_v19, %v175_v18  ;;  %v182_v24 = vld [vmem:[%s365_s1 + $0x40] sm:$0xff]  ;;  %171 = vst [vmem:[%s366_s2 + $0x20] sm:$0xff] %v46_v16  ;;  %v76_v25 = vmul.f32 %v179_v22, %v178_v20  ;;  %v184_v27 = vld [vmem:[%s364_s0 + $0x48] sm:$0xff] }
   0x8   :  { %174 = vst [vmem:[%s366_s2 + $0x28] sm:$0xff] %v56_v17  ;;  %v86_v26 = vmul.f32 %v182_v24, %v181_v23  ;;  %v185_v28 = vld [vmem:[%s365_s1 + $0x48] sm:$0xff]  ;;  %v187_v29 = vld [vmem:[%s364_s0 + $0x50] sm:$0xff]  ;;  %v190_v32 = vld [vmem:[%s364_s0 + $0x58] sm:$0xff] }
   0x9   :  { %177 = vst [vmem:[%s366_s2 + $0x30] sm:$0xff] %v66_v21  ;;  %v96_v30 = vmul.f32 %v185_v28, %v184_v27  ;;  %v188_v31 = vld [vmem:[%s365_s1 + $0x50] sm:$0xff]  ;;  %v191_v33 = vld [vmem:[%s365_s1 + $0x58] sm:$0xff]  ;;  %180 = vst [vmem:[%s366_s2 + $0x38] sm:$0xff] %v76_v25 }
   0xa   :  { %183 = vst [vmem:[%s366_s2 + $0x40] sm:$0xff] %v86_v26  ;;  %v106_v34 = vmul.f32 %v188_v31, %v187_v29  ;;  %v116_v35 = vmul.f32 %v191_v33, %v190_v32  ;;  %v193_v36 = vld [vmem:[%s364_s0 + $0x60] sm:$0xff]  ;;  %v196_v38 = vld [vmem:[%s364_s0 + $0x68] sm:$0xff]  ;;  %v199_v41 = vld [vmem:[%s364_s0 + $0x70] sm:$0xff] }
   0xb   :  { %v194_v37 = vld [vmem:[%s365_s1 + $0x60] sm:$0xff]  ;;  %186 = vst [vmem:[%s366_s2 + $0x48] sm:$0xff] %v96_v30  ;;  %v197_v40 = vld [vmem:[%s365_s1 + $0x68] sm:$0xff]  ;;  %v200_v42 = vld [vmem:[%s365_s1 + $0x70] sm:$0xff] }
   0xc   :  { %v126_v39 = vmul.f32 %v194_v37, %v193_v36  ;;  %189 = vst [vmem:[%s366_s2 + $0x50] sm:$0xff] %v106_v34  ;;  %192 = vst [vmem:[%s366_s2 + $0x58] sm:$0xff] %v116_v35  ;;  %v136_v43 = vmul.f32 %v197_v40, %v196_v38  ;;  %v146_v44 = vmul.f32 %v200_v42, %v199_v41  ;;  %v202_v45 = vld [vmem:[%s364_s0 + $0x78] sm:$0xff] }
   0xd   :  { %v203_v46 = vld [vmem:[%s365_s1 + $0x78] sm:$0xff] }
   0xe   :  { %195 = vst [vmem:[%s366_s2 + $0x60] sm:$0xff] %v126_v39  ;;  %v156_v47 = vmul.f32 %v203_v46, %v202_v45  ;;  %198 = vst [vmem:[%s366_s2 + $0x68] sm:$0xff] %v136_v43 }
   0xf   :  { %201 = vst [vmem:[%s366_s2 + $0x70] sm:$0xff] %v146_v44 }
  0x10   :  { %204 = vst [vmem:[%s366_s2 + $0x78] sm:$0xff] %v156_v47 }

// kernel: tile.18
= control target key start
LH: loop header
LB: loop body
LE: loop exit
PB: predicated region body
PF: predicated region fallthrough
CT: control target
= control target key end

     0   :  { %s22_s0 = inlined_call_operand.vmem [shape: f32[32], index: 0, kind: input, shape index: {}]   ;;  %s23_s1 = inlined_call_operand.vmem [shape: f32[4,32], index: 1, kind: output, shape index: {}]  }
   0x1   :  { %v4_v0 = vld [vmem:[%s22_s0] ss:$0 sm:$0xff] }
   0x2   :  { %5 = vst [vmem:[%s23_s1] sm:$0xf] %v4_v0 }

// kernel: tile.19
= control target key start
LH: loop header
LB: loop body
LE: loop exit
PB: predicated region body
PF: predicated region fallthrough
CT: control target
= control target key end

     0   :  { %vm7_vm0 = vcmask 261120   ;;  %s37_s8 = smov 32   ;;  %s38_s9 = smov 64   ;;  %vm13_vm1 = vcmask 1048320   ;;  %vm19_vm2 = vcmask 785920   ;;  %vm25_vm3 = vcmask 523520   ;;  %s55_s0 = inlined_call_operand.vmem [shape: f32[4,32], index: 0, kind: input, shape index: {}]   ;;  %s56_s1 = inlined_call_operand.vmem [shape: f32[1,128], index: 1, kind: output, shape index: {}]  }
   0x1   :  { %v4_v0 = vld [vmem:[%s55_s0] sm:$0xf]  ;;  %s36_s0 = smov 96  }
   0x2   :  { %5 = vst [vmem:[#allocation1] sm:$0xf] %v4_v0 }
   0x9   :  { %v10_v1 = vld [vmem:[#allocation1 + $0x3] sm:$0x1]   ;;  %v22_v2 = vld [vmem:[#allocation1 + $0x1] sm:$0x1]   ;;  %v6_v3 = vld [vmem:[#allocation1] sm:$0x1]  }
   0xa   :  { %11 = vrot.lane.b32.xlu0 %v10_v1, %s36_s0  ;;  %23 = vrot.lane.b32.xlu1 %v22_v2, %s37_s8  ;;  %v16_v4 = vld [vmem:[#allocation1 + $0x2] sm:$0x1]   ;;  %8 = vst.msk [vmem:[#allocation0] sm:$0x1] %vm7_vm0, %v6_v3  }
   0xe   :  { %17 = vrot.lane.b32.xlu0 %v16_v4, %s38_s9 }
  0x7c   :  { %v12_v5 = vpop.permute.xlu0 %11   ;;  %v24_v6 = vpop.permute.xlu1 %23  }
  0x7d   :  { %14 = vst.msk [vmem:[#allocation0] sm:$0x1] %vm13_vm1, %v12_v5  }
  0x80   :  { %v18_v7 = vpop.permute.xlu0 %17  }
  0x81   :  { %20 = vst.msk [vmem:[#allocation0] sm:$0x1] %vm19_vm2, %v18_v7  }
  0x82   :  { %26 = vst.msk [vmem:[#allocation0] sm:$0x1] %vm25_vm3, %v24_v6  }
  0x89   :  { %v30_v8 = vld [vmem:[#allocation0] sm:$0x1] }
  0x8a   :  { %32 = vst [vmem:[%s56_s1] sm:$0x1] %v30_v8 }

// kernel: sublayer_connection.1
= control target key start
LH: loop header
LB: loop body
LE: loop exit
PB: predicated region body
PF: predicated region fallthrough
CT: control target
= control target key end

     0   :  { %v3422_v0 = vmov 0.0|0.0   ;;  %vm3423_vm0 = vmmov 0   ;;  %v3424_v4 = vmov 0.0   ;;  %s4282_s1 = inlined_call_operand.vmem [shape: f32[128,128], index: 1, kind: input, shape index: {}]   ;;  %s4283_s0 = inlined_call_operand.vmem [shape: f32[8,128], index: 0, kind: input, shape index: {}]   ;;  %s4284_s4 = inlined_call_operand.vmem [shape: f32[128,128], index: 4, kind: input, shape index: {}]   ;;  %s4285_s2 = inlined_call_operand.vmem [shape: f32[1,128], index: 2, kind: input, shape index: {}]   ;;  %s4286_s3 = inlined_call_operand.vmem [shape: f32[1,128], index: 3, kind: input, shape index: {}]   ;;  %s4287_s5 = inlined_call_operand.vmem [shape: f32[1,128], index: 5, kind: input, shape index: {}]   ;;  %s4288_s6 = inlined_call_operand.vmem [shape: f32[8,128], index: 6, kind: output, shape index: {}]  }
   0x1   :  { %2962 = vmatprep.subr.bf16.mxu0 %v3422_v0  ;;  %v24_v1 = vld [vmem:[%s4282_s1] sm:$0xff]  ;;  %v25_v2 = vld [vmem:[%s4282_s1 + $0x8] sm:$0xff]  ;;  %v26_v3 = vld [vmem:[%s4282_s1 + $0x10] sm:$0xff]  ;;  %2364 = vmatprep.mubr.msk.f32.mxu0 %vm3423_vm0, %v3424_v4 }
   0x2   :  { %v41_v5 = vand.u32 4294901760, %v24_v1  ;;  %v44_v6 = vand.u32 4294901760, %v25_v2  ;;  %v27_v7 = vld [vmem:[%s4282_s1 + $0x18] sm:$0xff]  ;;  %v47_v8 = vand.u32 4294901760, %v26_v3  ;;  %3106 = vmatprep.subr.bf16.mxu1 %v3422_v0  ;;  %2574 = vmatprep.mubr.msk.f32.mxu1 %vm3423_vm0, %v3424_v4  ;;  %v28_v10 = vld [vmem:[%s4282_s1 + $0x20] sm:$0xff]  ;;  %v29_v11 = vld [vmem:[%s4282_s1 + $0x28] sm:$0xff] }
   0x3   :  { %v50_v9 = vand.u32 4294901760, %v27_v7  ;;  %v53_v14 = vand.u32 4294901760, %v28_v10  ;;  %v56_v15 = vand.u32 4294901760, %v29_v11  ;;  %v30_v16 = vld [vmem:[%s4282_s1 + $0x30] sm:$0xff]  ;;  %v31_v17 = vld [vmem:[%s4282_s1 + $0x38] sm:$0xff]  ;;  %v32_v21 = vld [vmem:[%s4282_s1 + $0x40] sm:$0xff] }
   0x4   :  { %v3484_v12 = vpack.c.bf16 %v44_v6, %v41_v5  ;;  %v59_v19 = vand.u32 4294901760, %v30_v16  ;;  %v62_v20 = vand.u32 4294901760, %v31_v17  ;;  %v3507_v22 = vld [vmem:[%s4283_s0] sm:$0xff]  ;;  %v33_v23 = vld [vmem:[%s4282_s1 + $0x48] sm:$0xff]  ;;  %v34_v24 = vld [vmem:[%s4282_s1 + $0x50] sm:$0xff]  ;;  %v65_v27 = vand.u32 4294901760, %v32_v21 }
   0x5   :  { %v3487_v13 = vpack.c.bf16 %v50_v9, %v47_v8  ;;  %v3499_v18 = vpack.c.bf16 %v56_v15, %v53_v14  ;;  %v35_v25 = vld [vmem:[%s4282_s1 + $0x58] sm:$0xff]  ;;  %v36_v26 = vld [vmem:[%s4282_s1 + $0x60] sm:$0xff]  ;;  %v37_v28 = vld [vmem:[%s4282_s1 + $0x68] sm:$0xff]  ;;  %v3534_v31 = vand.u32 4294901760, %v3507_v22  ;;  %v68_v33 = vand.u32 4294901760, %v33_v23 }
   0x6   :  { %2964 = vmatpush3.bf16.msra.mxu0 %v3484_v12  ;;  %3108 = vmatpush3.bf16.msra.mxu1 %v3484_v12  ;;  %v38_v29 = vld [vmem:[%s4282_s1 + $0x70] sm:$0xff]  ;;  %v39_v30 = vld [vmem:[%s4282_s1 + $0x78] sm:$0xff]  ;;  %v3537_v32 = vpack.c.bf16 %v62_v20, %v59_v19  ;;  %v3539_v34 = vsub.f32 %v24_v1, %v41_v5  ;;  %v3541_v35 = vsub.f32 %v25_v2, %v44_v6  ;;  %v71_v36 = vand.u32 4294901760, %v34_v24 }
   0x7   :  { %2965 = vmatprep.subr.bf16.mxu0 %v3422_v0  ;;  %3109 = vmatprep.subr.bf16.mxu1 %v3422_v0  ;;  %v74_v37 = vand.u32 4294901760, %v35_v25  ;;  %v77_v38 = vand.u32 4294901760, %v36_v26  ;;  %v80_v39 = vand.u32 4294901760, %v37_v28  ;;  %v83_v40 = vand.u32 4294901760, %v38_v29 }
   0x8   :  { %v86_v41 = vand.u32 4294901760, %v39_v30  ;;  %v3548_v42 = vsub.f32 %v3507_v22, %v3534_v31  ;;  %v3550_v43 = vsub.f32 %v26_v3, %v47_v8  ;;  %v3553_v44 = vpack.c.bf16 %v68_v33, %v65_v27 }
   0x9   :  { %v134_v45 = vand.u32 4294901760, %v3539_v34  ;;  %v141_v46 = vand.u32 4294901760, %v3541_v35  ;;  %v3557_v47 = vsub.f32 %v27_v7, %v50_v9  ;;  %v3561_v48 = vsub.f32 %v28_v10, %v53_v14 }
   0xa   :  { %2967 = vmatpush3.bf16.msra.mxu0 %v3487_v13  ;;  %3111 = vmatpush3.bf16.msra.mxu1 %v3487_v13  ;;  %v3564_v49 = vpack.c.bf16 %v74_v37, %v71_v36  ;;  %v3566_v50 = vpack.c.bf16 %v80_v39, %v77_v38  ;;  %v3568_v51 = vpack.c.bf16 %v86_v41, %v83_v40  ;;  %v123_v52 = vand.u32 4294901760, %v3548_v42 }
   0xb   :  { %2968 = vmatprep.subr.bf16.mxu0 %v3422_v0  ;;  %3112 = vmatprep.subr.bf16.mxu1 %v3422_v0  ;;  %v148_v53 = vand.u32 4294901760, %v3550_v43  ;;  %v3572_v54 = vsub.f32 %v29_v11, %v56_v15  ;;  %v3574_v55 = vsub.f32 %v30_v16, %v59_v19  ;;  %v135_v56 = vsub.f32 %v3539_v34, %v134_v45 }
   0xc   :  { %v142_v57 = vsub.f32 %v3541_v35, %v141_v46  ;;  %v155_v58 = vand.u32 4294901760, %v3557_v47  ;;  %v3580_v59 = vsub.f32 %v31_v17, %v62_v20  ;;  %v162_v60 = vand.u32 4294901760, %v3561_v48 }
   0xd   :  { %v3585_v61 = vsub.f32 %v32_v21, %v65_v27  ;;  %v3587_v62 = vsub.f32 %v33_v23, %v68_v33  ;;  %v3589_v63 = vsub.f32 %v34_v24, %v71_v36  ;;  %v3592_v1 = vsub.f32 %v35_v25, %v74_v37 }
   0xe   :  { %2970 = vmatpush3.bf16.msra.mxu0 %v3499_v18  ;;  %3114 = vmatpush3.bf16.msra.mxu1 %v3499_v18  ;;  %v3594_v2 = vsub.f32 %v36_v26, %v77_v38  ;;  %v3596_v3 = vsub.f32 %v37_v28, %v80_v39  ;;  %v3598_v5 = vsub.f32 %v38_v29, %v83_v40  ;;  %v169_v8 = vand.u32 4294901760, %v3572_v54 }
   0xf   :  { %2971 = vmatprep.subr.bf16.mxu0 %v3422_v0  ;;  %3115 = vmatprep.subr.bf16.mxu1 %v3422_v0  ;;  %v124_v6 = vsub.f32 %v3548_v42, %v123_v52  ;;  %v149_v7 = vsub.f32 %v3550_v43, %v148_v53  ;;  %v3605_v9 = vsub.f32 %v39_v30, %v86_v41  ;;  %v136_v10 = vand.u32 4294901760, %v135_v56 }
  0x10   :  { %v143_v11 = vand.u32 4294901760, %v142_v57  ;;  %v156_v14 = vsub.f32 %v3557_v47, %v155_v58  ;;  %v176_v15 = vand.u32 4294901760, %v3574_v55  ;;  %v183_v16 = vand.u32 4294901760, %v3580_v59 }
  0x11   :  { %v190_v17 = vand.u32 4294901760, %v3585_v61  ;;  %v197_v19 = vand.u32 4294901760, %v3587_v62  ;;  %v204_v20 = vand.u32 4294901760, %v3589_v63  ;;  %v211_v21 = vand.u32 4294901760, %v3592_v1 }
  0x12   :  { %2973 = vmatpush3.bf16.msra.mxu0 %v3537_v32  ;;  %3117 = vmatpush3.bf16.msra.mxu1 %v3537_v32  ;;  %v218_v23 = vand.u32 4294901760, %v3594_v2  ;;  %v225_v24 = vand.u32 4294901760, %v3596_v3  ;;  %v232_v25 = vand.u32 4294901760, %v3598_v5  ;;  %v239_v26 = vand.u32 4294901760, %v3605_v9 }
  0x13   :  { %2974 = vmatprep.subr.bf16.mxu0 %v3422_v0  ;;  %3118 = vmatprep.subr.bf16.mxu1 %v3422_v0  ;;  %v3622_v27 = vpack.c.bf16 %v141_v46, %v134_v45  ;;  %v3624_v28 = vpack.c.bf16 %v155_v58, %v148_v53  ;;  %v3626_v29 = vpack.c.bf16 %v169_v8, %v162_v60  ;;  %v125_v39 = vand.u32 4294901760, %v124_v6 }
  0x14   :  { %v3629_v30 = vpack.c.bf16 %v183_v16, %v176_v15  ;;  %v3631_v33 = vpack.c.bf16 %v197_v19, %v190_v17  ;;  %v3633_v36 = vpack.c.bf16 %v211_v21, %v204_v20  ;;  %v3635_v37 = vpack.c.bf16 %v225_v24, %v218_v23 }
  0x15   :  { %v3638_v38 = vpack.c.bf16 %v239_v26, %v232_v25  ;;  %v163_v40 = vsub.f32 %v3561_v48, %v162_v60  ;;  %v3644_v41 = vpack.c.bf16 %v143_v11, %v136_v10  ;;  %v150_v45 = vand.u32 4294901760, %v149_v7 }
  0x16   :  { %2976 = vmatpush3.bf16.msra.mxu0 %v3553_v44  ;;  %3120 = vmatpush3.bf16.msra.mxu1 %v3553_v44  ;;  %v157_v46 = vand.u32 4294901760, %v156_v14  ;;  %v170_v53 = vsub.f32 %v3572_v54, %v169_v8  ;;  %v177_v56 = vsub.f32 %v3574_v55, %v176_v15  ;;  %v184_v6 = vsub.f32 %v3580_v59, %v183_v16 }
  0x17   :  { %2977 = vmatprep.subr.bf16.mxu0 %v3422_v0  ;;  %3121 = vmatprep.subr.bf16.mxu1 %v3422_v0  ;;  %v164_v58 = vand.u32 4294901760, %v163_v40  ;;  %v191_v11 = vsub.f32 %v3585_v61, %v190_v17  ;;  %v198_v14 = vsub.f32 %v3587_v62, %v197_v19  ;;  %v205_v15 = vsub.f32 %v3589_v63, %v204_v20 }
  0x18   :  { %v3652_v57 = vpack.c.bf16 %v157_v46, %v150_v45  ;;  %v171_v60 = vand.u32 4294901760, %v170_v53  ;;  %v178_v7 = vand.u32 4294901760, %v177_v56  ;;  %v185_v10 = vand.u32 4294901760, %v184_v6 }
  0x19   :  { %v199_v40 = vand.u32 4294901760, %v198_v14  ;;  %v212_v45 = vsub.f32 %v3592_v1, %v211_v21  ;;  %v219_v46 = vsub.f32 %v3594_v2, %v218_v23  ;;  %v206_v19 = vand.u32 4294901760, %v205_v15 }
  0x1a   :  { %2979 = vmatpush3.bf16.msra.mxu0 %v3564_v49  ;;  %3123 = vmatpush3.bf16.msra.mxu1 %v3564_v49  ;;  %v3659_v8 = vpack.c.bf16 %v171_v60, %v164_v58  ;;  %v3666_v16 = vpack.c.bf16 %v185_v10, %v178_v7  ;;  %v226_v20 = vsub.f32 %v3596_v3, %v225_v24 }
  0x1b   :  { %2980 = vmatprep.subr.bf16.mxu0 %v3422_v0  ;;  %3124 = vmatprep.subr.bf16.mxu1 %v3422_v0  ;;  %v213_v53 = vand.u32 4294901760, %v212_v45  ;;  %v233_v56 = vsub.f32 %v3598_v5, %v232_v25  ;;  %v220_v21 = vand.u32 4294901760, %v219_v46  ;;  %v240_v23 = vsub.f32 %v3605_v9, %v239_v26  ;;  %v3976_v45 = vld [vmem:[%s4284_s4 + $0x30] sm:$0xff]  ;;  %v3981_v46 = vld [vmem:[%s4284_s4 + $0x38] sm:$0xff] }
  0x1c   :  { %v227_v60 = vand.u32 4294901760, %v226_v20  ;;  %v3693_v26 = vpack.c.bf16 %v3541_v35, %v3539_v34  ;;  %v3700_v10 = vpack.c.bf16 %v3557_v47, %v3550_v43  ;;  %v3708_v34 = vpack.c.bf16 %v3572_v54, %v3561_v48 }
  0x1d   :  { %v3678_v58 = vpack.c.bf16 %v213_v53, %v206_v19  ;;  %v234_v7 = vand.u32 4294901760, %v233_v56  ;;  %v241_v24 = vand.u32 4294901760, %v240_v23  ;;  %v3714_v35 = vpack.c.bf16 %v3580_v59, %v3574_v55 }
  0x1e   :  { %2982 = vmatpush3.bf16.msra.mxu0 %v3566_v50  ;;  %3126 = vmatpush3.bf16.msra.mxu1 %v3566_v50  ;;  %v3683_v6 = vpack.c.bf16 %v227_v60, %v220_v21  ;;  %v3720_v43 = vpack.c.bf16 %v3587_v62, %v3585_v61  ;;  %v3726_v47 = vpack.c.bf16 %v3592_v1, %v3589_v63  ;;  %v1395_v53 = vand.u32 4294901760, %v3976_v45 }
  0x1f   :  { %2983 = vmatprep.subr.bf16.mxu0 %v3422_v0  ;;  %3127 = vmatprep.subr.bf16.mxu1 %v3422_v0  ;;  %v3687_v25 = vpack.c.bf16 %v241_v24, %v234_v7  ;;  %v3732_v48 = vpack.c.bf16 %v3596_v3, %v3594_v2  ;;  %v3738_v54 = vpack.c.bf16 %v3605_v9, %v3598_v5  ;;  %v1398_v20 = vand.u32 4294901760, %v3981_v46  ;;  %v4007_v24 = vld [vmem:[%s4284_s4 + $0x40] sm:$0xff] }
  0x20   :  { %v3991_v60 = vsub.f32 %v3976_v45, %v1395_v53 }
  0x21   :  { %v3996_v23 = vsub.f32 %v3981_v46, %v1398_v20 }
  0x22   :  { %2985 = vmatpush3.bf16.msra.mxu0 %v3568_v51  ;;  %3129 = vmatpush3.bf16.msra.mxu1 %v3568_v51 }
  0x23   :  { %2986 = vmatprep.subr.bf16.mxu0 %v3422_v0  ;;  %3130 = vmatprep.subr.bf16.mxu1 %v3422_v0 }
  0x25   :  { %2365 = vmatmul.mubr.f32.vlgmr.msra.gmra.mrb[0].mxu0 %v125_v39  ;;  %v192_v39 = vand.u32 4294901760, %v191_v11 }
  0x26   :  { %2988 = vmatpush3.bf16.msra.mxu0 %v3644_v41  ;;  %2399 = vmatprep.mubr.msk.f32.mxu0 %vm3423_vm0, %v3424_v4 }
  0x27   :  { %2989 = vmatprep.subr.bf16.mxu0 %v3422_v0  ;;  %v3672_v17 = vpack.c.bf16 %v199_v40, %v192_v39 }
  0x2a   :  { %2991 = vmatpush3.bf16.msra.mxu0 %v3652_v57 }
  0x2b   :  { %2992 = vmatprep.subr.bf16.mxu0 %v3422_v0 }
  0x2e   :  { %2994 = vmatpush3.bf16.msra.mxu0 %v3659_v8 }
  0x2f   :  { %2995 = vmatprep.subr.bf16.mxu0 %v3422_v0 }
  0x32   :  { %2997 = vmatpush3.bf16.msra.mxu0 %v3666_v16 }
  0x33   :  { %2998 = vmatprep.subr.bf16.mxu0 %v3422_v0 }
  0x36   :  { %3000 = vmatpush3.bf16.msra.mxu0 %v3672_v17 }
  0x37   :  { %3001 = vmatprep.subr.bf16.mxu0 %v3422_v0 }
  0x3a   :  { %3003 = vmatpush3.bf16.msra.mxu0 %v3678_v58 }
  0x3b   :  { %3004 = vmatprep.subr.bf16.mxu0 %v3422_v0 }
  0x3e   :  { %3006 = vmatpush3.bf16.msra.mxu0 %v3683_v6 }
  0x3f   :  { %3007 = vmatprep.subr.bf16.mxu0 %v3422_v0 }
  0x42   :  { %3009 = vmatpush3.bf16.msra.mxu0 %v3687_v25 }
  0x43   :  { %3010 = vmatprep.subr.bf16.mxu0 %v3422_v0 }
  0x45   :  { %2400 = vmatmul.mubr.f32.vlgmr.msra.gmra.mrb[0].mxu0 %v3534_v31 }
  0x46   :  { %3012 = vmatpush3.bf16.msra.mxu0 %v3693_v26  ;;  %2434 = vmatprep.mubr.msk.f32.mxu0 %vm3423_vm0, %v3424_v4 }
  0x47   :  { %3013 = vmatprep.subr.bf16.mxu0 %v3422_v0 }
  0x4a   :  { %3015 = vmatpush3.bf16.msra.mxu0 %v3700_v10 }
  0x4b   :  { %3016 = vmatprep.subr.bf16.mxu0 %v3422_v0 }
  0x4e   :  { %3018 = vmatpush3.bf16.msra.mxu0 %v3708_v34 }
  0x4f   :  { %3019 = vmatprep.subr.bf16.mxu0 %v3422_v0 }
  0x52   :  { %3021 = vmatpush3.bf16.msra.mxu0 %v3714_v35 }
  0x53   :  { %3022 = vmatprep.subr.bf16.mxu0 %v3422_v0 }
  0x56   :  { %3024 = vmatpush3.bf16.msra.mxu0 %v3720_v43 }
  0x57   :  { %3025 = vmatprep.subr.bf16.mxu0 %v3422_v0 }
  0x5a   :  { %3027 = vmatpush3.bf16.msra.mxu0 %v3726_v47 }
  0x5b   :  { %3028 = vmatprep.subr.bf16.mxu0 %v3422_v0 }
  0x5e   :  { %3030 = vmatpush3.bf16.msra.mxu0 %v3732_v48 }
  0x5f   :  { %3031 = vmatprep.subr.bf16.mxu0 %v3422_v0 }
  0x62   :  { %3033 = vmatpush3.bf16.msra.mxu0 %v3738_v54 }
  0x63   :  { %3034 = vmatprep.subr.bf16.mxu0 %v3422_v0 }
  0x65   :  { %2435 = vmatmul.mubr.f32.vlgmr.msra.gmra.mrb[0].mxu0 %v3548_v42 }
  0x66   :  { %3036 = vmatpush3.bf16.msra.mxu0 %v3484_v12  ;;  %2469 = vmatprep.mubr.msk.f32.mxu0 %vm3423_vm0, %v3424_v4 }
  0x67   :  { %3037 = vmatprep.subr.bf16.mxu0 %v3422_v0 }
  0x6a   :  { %3039 = vmatpush3.bf16.msra.mxu0 %v3487_v13 }
  0x6b   :  { %3040 = vmatprep.subr.bf16.mxu0 %v3422_v0 }
  0x6e   :  { %3042 = vmatpush3.bf16.msra.mxu0 %v3499_v18 }
  0x6f   :  { %3043 = vmatprep.subr.bf16.mxu0 %v3422_v0 }
  0x72   :  { %3045 = vmatpush3.bf16.msra.mxu0 %v3537_v32 }
  0x73   :  { %3046 = vmatprep.subr.bf16.mxu0 %v3422_v0 }
  0x76   :  { %3048 = vmatpush3.bf16.msra.mxu0 %v3553_v44 }
  0x77   :  { %3049 = vmatprep.subr.bf16.mxu0 %v3422_v0 }
  0x7a   :  { %3051 = vmatpush3.bf16.msra.mxu0 %v3564_v49 }
  0x7b   :  { %3052 = vmatprep.subr.bf16.mxu0 %v3422_v0 }
  0x7e   :  { %3054 = vmatpush3.bf16.msra.mxu0 %v3566_v50 }
  0x7f   :  { %3055 = vmatprep.subr.bf16.mxu0 %v3422_v0 }
  0x82   :  { %3057 = vmatpush3.bf16.msra.mxu0 %v3568_v51 }
  0x83   :  { %3058 = vmatprep.subr.bf16.mxu0 %v3422_v0 }
  0x85   :  { %2470 = vmatmul.mubr.f32.vlgmr.msra.gmra.mrb[0].mxu0 %v123_v52 }
  0x86   :  { %3060 = vmatpush3.bf16.msra.mxu0 %v3622_v27  ;;  %2504 = vmatprep.mubr.msk.f32.mxu0 %vm3423_vm0, %v3424_v4 }
  0x87   :  { %3061 = vmatprep.subr.bf16.mxu0 %v3422_v0 }
  0x8a   :  { %3063 = vmatpush3.bf16.msra.mxu0 %v3624_v28 }
  0x8b   :  { %3064 = vmatprep.subr.bf16.mxu0 %v3422_v0 }
  0x8e   :  { %3066 = vmatpush3.bf16.msra.mxu0 %v3626_v29 }
  0x8f   :  { %3067 = vmatprep.subr.bf16.mxu0 %v3422_v0 }
  0x92   :  { %3069 = vmatpush3.bf16.msra.mxu0 %v3629_v30 }
  0x93   :  { %3070 = vmatprep.subr.bf16.mxu0 %v3422_v0 }
  0x96   :  { %3072 = vmatpush3.bf16.msra.mxu0 %v3631_v33 }
  0x97   :  { %3073 = vmatprep.subr.bf16.mxu0 %v3422_v0 }
  0x9a   :  { %3075 = vmatpush3.bf16.msra.mxu0 %v3633_v36 }
  0x9b   :  { %3076 = vmatprep.subr.bf16.mxu0 %v3422_v0 }
  0x9e   :  { %3078 = vmatpush3.bf16.msra.mxu0 %v3635_v37 }
  0x9f   :  { %3079 = vmatprep.subr.bf16.mxu0 %v3422_v0 }
  0xa2   :  { %3081 = vmatpush3.bf16.msra.mxu0 %v3638_v38 }
  0xa3   :  { %3082 = vmatprep.subr.bf16.mxu0 %v3422_v0 }
  0xa5   :  { %2505 = vmatmul.mubr.f32.vlgmr.msra.gmra.mrb[0].mxu0 %v3534_v31 }
  0xa6   :  { %3084 = vmatpush3.bf16.msra.mxu0 %v3484_v12  ;;  %2539 = vmatprep.mubr.msk.f32.mxu0 %vm3423_vm0, %v3424_v4 }
  0xa7   :  { %3085 = vmatprep.subr.bf16.mxu0 %v3422_v0 }
  0xaa   :  { %3087 = vmatpush3.bf16.msra.mxu0 %v3487_v13 }
  0xab   :  { %3088 = vmatprep.subr.bf16.mxu0 %v3422_v0 }
  0xae   :  { %3090 = vmatpush3.bf16.msra.mxu0 %v3499_v18 }
  0xaf   :  { %3091 = vmatprep.subr.bf16.mxu0 %v3422_v0 }
  0xb2   :  { %3093 = vmatpush3.bf16.msra.mxu0 %v3537_v32 }
  0xb3   :  { %3094 = vmatprep.subr.bf16.mxu0 %v3422_v0 }
  0xb6   :  { %3096 = vmatpush3.bf16.msra.mxu0 %v3553_v44 }
  0xb7   :  { %3097 = vmatprep.subr.bf16.mxu0 %v3422_v0 }
  0xba   :  { %3099 = vmatpush3.bf16.msra.mxu0 %v3564_v49 }
  0xbb   :  { %3100 = vmatprep.subr.bf16.mxu0 %v3422_v0 }
  0xbe   :  { %3102 = vmatpush3.bf16.msra.mxu0 %v3566_v50 }
  0xbf   :  { %3103 = vmatprep.subr.bf16.mxu0 %v3422_v0 }
  0xc2   :  { %3105 = vmatpush3.bf16.msra.mxu0 %v3568_v51 }
  0xc3   :  { %3250 = vmatprep.subr.bf16.mxu0 %v3422_v0 }
  0xc5   :  { %2540 = vmatmul.mubr.f32.vlgmr.msra.gmra.mrb[0].mxu0 %v3534_v31 }
  0xc6   :  { %2784 = vmatprep.mubr.msk.f32.mxu0 %vm3423_vm0, %v3424_v4 }
 0x198   :  { %v677_v42 = vpop.f32.mrb[0].mxu0 }
 0x199   :  { %v681_v52 = vmul.f32 0.03125, %v677_v42  ;;  %v2541_v55 = vpop.f32.mrb[1].mxu0 }
 0x19b   :  { %v3805_v59 = vsub.f32 %v3507_v22, %v681_v52 }
 0x19d   :  { %v683_v61 = vmul.f32 %v3805_v59, %v3805_v59 }
 0x19f   :  { %v3809_v62 = vand.u32 4294901760, %v683_v61 }
 0x1a1   :  { %v766_v63 = vsub.f32 %v683_v61, %v3809_v62 }
 0x1a3   :  { %v767_v1 = vand.u32 4294901760, %v766_v63 }
 0x1a5   :  { %v768_v2 = vsub.f32 %v766_v63, %v767_v1 }
 0x1a7   :  { %v769_v3 = vand.u32 4294901760, %v768_v2 }
 0x1a9   :  { %2575 = vmatmul.mubr.f32.vlgmr.msra.gmra.mrb[0].mxu1 %v769_v3 }
 0x1aa   :  { %3132 = vmatpush3.bf16.msra.mxu1 %v3644_v41  ;;  %2609 = vmatprep.mubr.msk.f32.mxu1 %vm3423_vm0, %v3424_v4 }
 0x1ab   :  { %3133 = vmatprep.subr.bf16.mxu1 %v3422_v0 }
 0x1ae   :  { %3135 = vmatpush3.bf16.msra.mxu1 %v3652_v57 }
 0x1af   :  { %3136 = vmatprep.subr.bf16.mxu1 %v3422_v0 }
 0x1b2   :  { %3138 = vmatpush3.bf16.msra.mxu1 %v3659_v8 }
 0x1b3   :  { %3139 = vmatprep.subr.bf16.mxu1 %v3422_v0 }
 0x1b6   :  { %3141 = vmatpush3.bf16.msra.mxu1 %v3666_v16 }
 0x1b7   :  { %3142 = vmatprep.subr.bf16.mxu1 %v3422_v0 }
 0x1ba   :  { %3144 = vmatpush3.bf16.msra.mxu1 %v3672_v17 }
 0x1bb   :  { %3145 = vmatprep.subr.bf16.mxu1 %v3422_v0 }
 0x1be   :  { %3147 = vmatpush3.bf16.msra.mxu1 %v3678_v58 }
 0x1bf   :  { %3148 = vmatprep.subr.bf16.mxu1 %v3422_v0 }
 0x1c2   :  { %3150 = vmatpush3.bf16.msra.mxu1 %v3683_v6 }
 0x1c3   :  { %3151 = vmatprep.subr.bf16.mxu1 %v3422_v0 }
 0x1c6   :  { %3153 = vmatpush3.bf16.msra.mxu1 %v3687_v25  ;;  %v4012_v25 = vld [vmem:[%s4284_s4 + $0x48] sm:$0xff] }
 0x1c7   :  { %3154 = vmatprep.subr.bf16.mxu1 %v3422_v0 }
 0x1c9   :  { %2610 = vmatmul.mubr.f32.vlgmr.msra.gmra.mrb[0].mxu1 %v3809_v62 }
 0x1ca   :  { %3156 = vmatpush3.bf16.msra.mxu1 %v3693_v26  ;;  %2644 = vmatprep.mubr.msk.f32.mxu1 %vm3423_vm0, %v3424_v4  ;;  %v1512_v26 = vand.u32 4294901760, %v3991_v60 }
 0x1cb   :  { %3157 = vmatprep.subr.bf16.mxu1 %v3422_v0 }
 0x1ce   :  { %3159 = vmatpush3.bf16.msra.mxu1 %v3700_v10  ;;  %v1519_v10 = vand.u32 4294901760, %v3996_v23 }
 0x1cf   :  { %3160 = vmatprep.subr.bf16.mxu1 %v3422_v0 }
 0x1d0   :  { %v1520_v42 = vsub.f32 %v3996_v23, %v1519_v10 }
 0x1d2   :  { %3162 = vmatpush3.bf16.msra.mxu1 %v3708_v34  ;;  %v1401_v34 = vand.u32 4294901760, %v4007_v24  ;;  %v1521_v2 = vand.u32 4294901760, %v1520_v42 }
 0x1d3   :  { %3163 = vmatprep.subr.bf16.mxu1 %v3422_v0 }
 0x1d4   :  { %v4030_v52 = vsub.f32 %v4007_v24, %v1401_v34 }
 0x1d6   :  { %3165 = vmatpush3.bf16.msra.mxu1 %v3714_v35  ;;  %v1404_v35 = vand.u32 4294901760, %v4012_v25  ;;  %v1526_v3 = vand.u32 4294901760, %v4030_v52 }
 0x1d7   :  { %3166 = vmatprep.subr.bf16.mxu1 %v3422_v0 }
 0x1d8   :  { %v4035_v61 = vsub.f32 %v4012_v25, %v1404_v35 }
 0x1da   :  { %3168 = vmatpush3.bf16.msra.mxu1 %v3720_v43 }
 0x1db   :  { %3169 = vmatprep.subr.bf16.mxu1 %v3422_v0 }
 0x1de   :  { %3171 = vmatpush3.bf16.msra.mxu1 %v3726_v47 }
 0x1df   :  { %3172 = vmatprep.subr.bf16.mxu1 %v3422_v0 }
 0x1e2   :  { %3174 = vmatpush3.bf16.msra.mxu1 %v3732_v48 }
 0x1e3   :  { %3175 = vmatprep.subr.bf16.mxu1 %v3422_v0 }
 0x1e6   :  { %3177 = vmatpush3.bf16.msra.mxu1 %v3738_v54  ;;  %v1513_v54 = vsub.f32 %v3991_v60, %v1512_v26 }
 0x1e7   :  { %3178 = vmatprep.subr.bf16.mxu1 %v3422_v0 }
 0x1e9   :  { %2645 = vmatmul.mubr.f32.vlgmr.msra.gmra.mrb[0].mxu1 %v766_v63  ;;  %v4045_v63 = vld [vmem:[%s4284_s4 + $0x58] sm:$0xff] }
 0x1ea   :  { %3180 = vmatpush3.bf16.msra.mxu1 %v3484_v12  ;;  %2679 = vmatprep.mubr.msk.f32.mxu1 %vm3423_vm0, %v3424_v4 }
 0x1eb   :  { %3181 = vmatprep.subr.bf16.mxu1 %v3422_v0 }
 0x1ee   :  { %3183 = vmatpush3.bf16.msra.mxu1 %v3487_v13 }
 0x1ef   :  { %3184 = vmatprep.subr.bf16.mxu1 %v3422_v0 }
 0x1f2   :  { %3186 = vmatpush3.bf16.msra.mxu1 %v3499_v18 }
 0x1f3   :  { %3187 = vmatprep.subr.bf16.mxu1 %v3422_v0 }
 0x1f6   :  { %3189 = vmatpush3.bf16.msra.mxu1 %v3537_v32 }
 0x1f7   :  { %3190 = vmatprep.subr.bf16.mxu1 %v3422_v0 }
 0x1fa   :  { %3192 = vmatpush3.bf16.msra.mxu1 %v3553_v44 }
 0x1fb   :  { %3193 = vmatprep.subr.bf16.mxu1 %v3422_v0 }
 0x1fe   :  { %3195 = vmatpush3.bf16.msra.mxu1 %v3564_v49 }
 0x1ff   :  { %3196 = vmatprep.subr.bf16.mxu1 %v3422_v0 }
 0x202   :  { %3198 = vmatpush3.bf16.msra.mxu1 %v3566_v50 }
 0x203   :  { %3199 = vmatprep.subr.bf16.mxu1 %v3422_v0 }
 0x206   :  { %3201 = vmatpush3.bf16.msra.mxu1 %v3568_v51 }
 0x207   :  { %3202 = vmatprep.subr.bf16.mxu1 %v3422_v0 }
 0x209   :  { %2680 = vmatmul.mubr.f32.vlgmr.msra.gmra.mrb[0].mxu1 %v767_v1  ;;  %v1514_v1 = vand.u32 4294901760, %v1513_v54 }
 0x20a   :  { %3204 = vmatpush3.bf16.msra.mxu1 %v3622_v27  ;;  %2714 = vmatprep.mubr.msk.f32.mxu1 %vm3423_vm0, %v3424_v4 }
 0x20b   :  { %3205 = vmatprep.subr.bf16.mxu1 %v3422_v0 }
 0x20e   :  { %3207 = vmatpush3.bf16.msra.mxu1 %v3624_v28 }
 0x20f   :  { %3208 = vmatprep.subr.bf16.mxu1 %v3422_v0 }
 0x212   :  { %3210 = vmatpush3.bf16.msra.mxu1 %v3626_v29 }
 0x213   :  { %3211 = vmatprep.subr.bf16.mxu1 %v3422_v0 }
 0x216   :  { %3213 = vmatpush3.bf16.msra.mxu1 %v3629_v30 }
 0x217   :  { %3214 = vmatprep.subr.bf16.mxu1 %v3422_v0 }
 0x21a   :  { %3216 = vmatpush3.bf16.msra.mxu1 %v3631_v33  ;;  %v3946_v33 = vld [vmem:[%s4284_s4 + $0x20] sm:$0xff] }
 0x21b   :  { %3217 = vmatprep.subr.bf16.mxu1 %v3422_v0  ;;  %v1389_v8 = vand.u32 4294901760, %v3946_v33 }
 0x21d   :  { %v3966_v39 = vsub.f32 %v3946_v33, %v1389_v8  ;;  %v1367_v33 = vld [vmem:[%s4284_s4 + $0x70] sm:$0xff] }
 0x21e   :  { %3219 = vmatpush3.bf16.msra.mxu1 %v3633_v36  ;;  %v3951_v36 = vld [vmem:[%s4284_s4 + $0x28] sm:$0xff] }
 0x21f   :  { %3220 = vmatprep.subr.bf16.mxu1 %v3422_v0  ;;  %v1392_v11 = vand.u32 4294901760, %v3951_v36  ;;  %v1498_v56 = vand.u32 4294901760, %v3966_v39 }
 0x221   :  { %v3971_v40 = vsub.f32 %v3951_v36, %v1392_v11  ;;  %v1499_v6 = vsub.f32 %v3966_v39, %v1498_v56  ;;  %v1368_v36 = vld [vmem:[%s4284_s4 + $0x78] sm:$0xff] }
 0x222   :  { %3222 = vmatpush3.bf16.msra.mxu1 %v3635_v37 }
 0x223   :  { %3223 = vmatprep.subr.bf16.mxu1 %v3422_v0  ;;  %v1505_v58 = vand.u32 4294901760, %v3971_v40  ;;  %v1500_v43 = vand.u32 4294901760, %v1499_v6 }
 0x225   :  { %v1506_v7 = vsub.f32 %v3971_v40, %v1505_v58 }
 0x226   :  { %3225 = vmatpush3.bf16.msra.mxu1 %v3638_v38 }
 0x227   :  { %3226 = vmatprep.subr.bf16.mxu1 %v3422_v0  ;;  %v1507_v47 = vand.u32 4294901760, %v1506_v7 }
 0x229   :  { %2715 = vmatmul.mubr.f32.vlgmr.msra.gmra.mrb[0].mxu1 %v3809_v62  ;;  %v3281_v55 = vpack.c.bf16 %v1507_v47, %v1500_v43 }
 0x22a   :  { %3228 = vmatpush3.bf16.msra.mxu1 %v3484_v12  ;;  %2749 = vmatprep.mubr.msk.f32.mxu1 %vm3423_vm0, %v3424_v4  ;;  %v1353_v12 = vld [vmem:[%s4284_s4] sm:$0xff] }
 0x22b   :  { %3229 = vmatprep.subr.bf16.mxu1 %v3422_v0 }
 0x22e   :  { %3231 = vmatpush3.bf16.msra.mxu1 %v3487_v13  ;;  %v1354_v13 = vld [vmem:[%s4284_s4 + $0x8] sm:$0xff] }
 0x22f   :  { %3232 = vmatprep.subr.bf16.mxu1 %v3422_v0  ;;  %v1380_v22 = vand.u32 4294901760, %v1354_v13 }
 0x232   :  { %3234 = vmatpush3.bf16.msra.mxu1 %v3499_v18  ;;  %v1377_v18 = vand.u32 4294901760, %v1353_v12 }
 0x233   :  { %3235 = vmatprep.subr.bf16.mxu1 %v3422_v0 }
 0x234   :  { %v3913_v31 = vsub.f32 %v1353_v12, %v1377_v18  ;;  %v4019_v48 = vpack.c.bf16 %v1380_v22, %v1377_v18  ;;  %v1410_v18 = vand.u32 4294901760, %v4045_v63 }
 0x236   :  { %3237 = vmatpush3.bf16.msra.mxu1 %v3537_v32  ;;  %v3915_v32 = vsub.f32 %v1354_v13, %v1380_v22  ;;  %3252 = vmatpush3.bf16.msra.mxu0 %v4019_v48  ;;  %v1533_v13 = vand.u32 4294901760, %v4035_v61 }
 0x237   :  { %3238 = vmatprep.subr.bf16.mxu1 %v3422_v0  ;;  %3253 = vmatprep.subr.bf16.mxu0 %v3422_v0 }
 0x23a   :  { %3240 = vmatpush3.bf16.msra.mxu1 %v3553_v44  ;;  %v3920_v44 = vld [vmem:[%s4284_s4 + $0x10] sm:$0xff] }
 0x23b   :  { %3241 = vmatprep.subr.bf16.mxu1 %v3422_v0  ;;  %v1383_v5 = vand.u32 4294901760, %v3920_v44 }
 0x23d   :  { %v3938_v29 = vsub.f32 %v3920_v44, %v1383_v5  ;;  %v3284_v44 = vpack.c.bf16 %v1521_v2, %v1514_v1  ;;  %v1422_v1 = vand.u32 4294901760, %v1368_v36 }
 0x23e   :  { %3243 = vmatpush3.bf16.msra.mxu1 %v3564_v49  ;;  %v3925_v49 = vld [vmem:[%s4284_s4 + $0x18] sm:$0xff] }
 0x23f   :  { %3244 = vmatprep.subr.bf16.mxu1 %v3422_v0  ;;  %v1386_v9 = vand.u32 4294901760, %v3925_v49  ;;  %v1484_v41 = vand.u32 4294901760, %v3938_v29  ;;  %v4120_v2 = vsub.f32 %v1368_v36, %v1422_v1 }
 0x241   :  { %v3941_v30 = vsub.f32 %v3925_v49, %v1386_v9  ;;  %v1485_v15 = vsub.f32 %v3938_v29, %v1484_v41  ;;  %v4054_v22 = vpack.c.bf16 %v1386_v9, %v1383_v5  ;;  %v1527_v49 = vsub.f32 %v4030_v52, %v1526_v3  ;;  %v1365_v5 = vld [vmem:[%s4284_s4 + $0x60] sm:$0xff]  ;;  %v1366_v9 = vld [vmem:[%s4284_s4 + $0x68] sm:$0xff] }
 0x242   :  { %3246 = vmatpush3.bf16.msra.mxu1 %v3566_v50  ;;  %v1470_v50 = vand.u32 4294901760, %v3913_v31 }
 0x243   :  { %3247 = vmatprep.subr.bf16.mxu1 %v3422_v0  ;;  %v1491_v57 = vand.u32 4294901760, %v3941_v30  ;;  %v1486_v17 = vand.u32 4294901760, %v1485_v15  ;;  %3255 = vmatpush3.bf16.msra.mxu0 %v4054_v22  ;;  %v1413_v15 = vand.u32 4294901760, %v1365_v5 }
 0x244   :  { %v1471_v27 = vsub.f32 %v3913_v31, %v1470_v50  ;;  %3256 = vmatprep.subr.bf16.mxu0 %v3422_v0 }
 0x245   :  { %v1492_v16 = vsub.f32 %v3941_v30, %v1491_v57  ;;  %v4088_v7 = vsub.f32 %v1365_v5, %v1413_v15 }
 0x246   :  { %3249 = vmatpush3.bf16.msra.mxu1 %v3568_v51  ;;  %v1477_v51 = vand.u32 4294901760, %v3915_v32  ;;  %v1472_v37 = vand.u32 4294901760, %v1471_v27 }
 0x247   :  { %3274 = vmatprep.subr.bf16.mxu1 %v3422_v0  ;;  %v1493_v19 = vand.u32 4294901760, %v1492_v16  ;;  %v1416_v16 = vand.u32 4294901760, %v1366_v9  ;;  %v1554_v42 = vand.u32 4294901760, %v4088_v7 }
 0x248   :  { %v1478_v28 = vsub.f32 %v3915_v32, %v1477_v51 }
 0x249   :  { %2750 = vmatmul.mubr.f32.vlgmr.msra.gmra.mrb[0].mxu1 %v3809_v62  ;;  %v3278_v21 = vpack.c.bf16 %v1493_v19, %v1486_v17  ;;  %v4040_v62 = vld [vmem:[%s4284_s4 + $0x50] sm:$0xff]  ;;  %v4090_v43 = vsub.f32 %v1366_v9, %v1416_v16  ;;  %v1555_v45 = vsub.f32 %v4088_v7, %v1554_v42  ;;  %v1575_v9 = vand.u32 4294901760, %v4120_v2 }
 0x24a   :  { %2819 = vmatprep.mubr.msk.f32.mxu1 %vm3423_vm0, %v3424_v4  ;;  %v1479_v38 = vand.u32 4294901760, %v1478_v28  ;;  %v1407_v12 = vand.u32 4294901760, %v4040_v62  ;;  %v1534_v28 = vsub.f32 %v4035_v61, %v1533_v13 }
 0x24b   :  { %v1576_v25 = vsub.f32 %v4120_v2, %v1575_v9 }
 0x24c   :  { %v3275_v14 = vpack.c.bf16 %v1479_v38, %v1472_v37  ;;  %v4060_v27 = vsub.f32 %v4040_v62, %v1407_v12  ;;  %v4066_v37 = vsub.f32 %v4045_v63, %v1410_v18  ;;  %v1528_v38 = vand.u32 4294901760, %v1527_v49 }
 0x24d   :  { %v1535_v17 = vand.u32 4294901760, %v1534_v28  ;;  %v1419_v63 = vand.u32 4294901760, %v1367_v33  ;;  %v1556_v49 = vand.u32 4294901760, %v1555_v45 }
 0x24e   :  { %3276 = vmatpush3.bf16.msra.mxu1 %v3275_v14  ;;  %v1540_v14 = vand.u32 4294901760, %v4060_v27  ;;  %v1547_v19 = vand.u32 4294901760, %v4066_v37  ;;  %v3314_v36 = vpack.c.bf16 %v4066_v37, %v4060_v27 }
 0x24f   :  { %3277 = vmatprep.subr.bf16.mxu1 %v3422_v0  ;;  %v3287_v47 = vpack.c.bf16 %v1535_v17, %v1528_v38  ;;  %v1577_v17 = vand.u32 4294901760, %v1576_v25  ;;  %v2023_v25 = vld [vmem:[%s4285_s2] ss:$0 sm:$0xff] }
 0x250   :  { %v1541_v6 = vsub.f32 %v4060_v27, %v1540_v14  ;;  %v1548_v54 = vsub.f32 %v4066_v37, %v1547_v19 }
 0x252   :  { %3279 = vmatpush3.bf16.msra.mxu1 %v3278_v21  ;;  %v4083_v21 = vpack.c.bf16 %v1392_v11, %v1389_v8  ;;  %v4106_v8 = vpack.c.bf16 %v1398_v20, %v1395_v53  ;;  %v1542_v11 = vand.u32 4294901760, %v1541_v6  ;;  %v1549_v62 = vand.u32 4294901760, %v1548_v54 }
 0x253   :  { %3280 = vmatprep.subr.bf16.mxu1 %v3422_v0  ;;  %v4118_v20 = vsub.f32 %v1367_v33, %v1419_v63  ;;  %v3308_v54 = vpack.c.bf16 %v3996_v23, %v3991_v60  ;;  %v3311_v33 = vpack.c.bf16 %v4035_v61, %v4030_v52 }
 0x254   :  { %3258 = vmatpush3.bf16.msra.mxu0 %v4083_v21  ;;  %v3290_v53 = vpack.c.bf16 %v1549_v62, %v1542_v11  ;;  %v3317_v11 = vpack.c.bf16 %v4090_v43, %v4088_v7 }
 0x255   :  { %3259 = vmatprep.subr.bf16.mxu0 %v3422_v0  ;;  %v1568_v5 = vand.u32 4294901760, %v4118_v20  ;;  %v3320_v62 = vpack.c.bf16 %v4120_v2, %v4118_v20 }
 0x256   :  { %3282 = vmatpush3.bf16.msra.mxu1 %v3281_v55  ;;  %v1561_v55 = vand.u32 4294901760, %v4090_v43 }
 0x257   :  { %3283 = vmatprep.subr.bf16.mxu1 %v3422_v0  ;;  %v1569_v24 = vsub.f32 %v4118_v20, %v1568_v5 }
 0x258   :  { %v1562_v46 = vsub.f32 %v4090_v43, %v1561_v55  ;;  %3261 = vmatpush3.bf16.msra.mxu0 %v4106_v8 }
 0x259   :  { %3262 = vmatprep.subr.bf16.mxu0 %v3422_v0 }
 0x25a   :  { %3285 = vmatpush3.bf16.msra.mxu1 %v3284_v44  ;;  %v4127_v44 = vpack.c.bf16 %v1404_v35, %v1401_v34  ;;  %v1563_v28 = vand.u32 4294901760, %v1562_v46  ;;  %v4140_v34 = vpack.c.bf16 %v1410_v18, %v1407_v12  ;;  %v1570_v35 = vand.u32 4294901760, %v1569_v24 }
 0x25b   :  { %3286 = vmatprep.subr.bf16.mxu1 %v3422_v0  ;;  %v4151_v12 = vpack.c.bf16 %v1422_v1, %v1419_v63  ;;  %v3299_v18 = vpack.c.bf16 %v3915_v32, %v3913_v31  ;;  %v3353_v31 = vpack.c.bf16 %v1505_v58, %v1498_v56  ;;  %v3359_v32 = vpack.c.bf16 %v1533_v13, %v1526_v3 }
 0x25c   :  { %v3293_v38 = vpack.c.bf16 %v1563_v28, %v1556_v49  ;;  %3264 = vmatpush3.bf16.msra.mxu0 %v4127_v44  ;;  %v3296_v6 = vpack.c.bf16 %v1577_v17, %v1570_v35  ;;  %v1343_v35 = vmul.f32 %v2023_v25, %v3805_v59 }
 0x25d   :  { %3265 = vmatprep.subr.bf16.mxu0 %v3422_v0 }
 0x25e   :  { %3288 = vmatpush3.bf16.msra.mxu1 %v3287_v47  ;;  %v4145_v47 = vpack.c.bf16 %v1416_v16, %v1413_v15  ;;  %v3302_v15 = vpack.c.bf16 %v3941_v30, %v3938_v29  ;;  %v3305_v16 = vpack.c.bf16 %v3971_v40, %v3966_v39  ;;  %v3368_v29 = vpack.c.bf16 %v1575_v9, %v1568_v5 }
 0x25f   :  { %3289 = vmatprep.subr.bf16.mxu1 %v3422_v0 }
 0x260   :  { %3267 = vmatpush3.bf16.msra.mxu0 %v4140_v34 }
 0x261   :  { %3268 = vmatprep.subr.bf16.mxu0 %v3422_v0 }
 0x262   :  { %3291 = vmatpush3.bf16.msra.mxu1 %v3290_v53 }
 0x263   :  { %3292 = vmatprep.subr.bf16.mxu1 %v3422_v0 }
 0x264   :  { %3270 = vmatpush3.bf16.msra.mxu0 %v4145_v47 }
 0x265   :  { %3271 = vmatprep.subr.bf16.mxu0 %v3422_v0 }
 0x266   :  { %3294 = vmatpush3.bf16.msra.mxu1 %v3293_v38 }
 0x267   :  { %3295 = vmatprep.subr.bf16.mxu1 %v3422_v0 }
 0x268   :  { %3273 = vmatpush3.bf16.msra.mxu0 %v4151_v12 }
 0x269   :  { %3298 = vmatprep.subr.bf16.mxu0 %v3422_v0 }
 0x26a   :  { %3297 = vmatpush3.bf16.msra.mxu1 %v3296_v6  ;;  %v2024_v6 = vld [vmem:[%s4286_s3] ss:$0 sm:$0xff] }
 0x26b   :  { %3322 = vmatprep.subr.bf16.mxu1 %v3422_v0 }
 0x31c   :  { %v1321_v63 = vpop.f32.mrb[0].mxu1 }
 0x31d   :  { %v1325_v1 = vmul.f32 0.032258064, %v1321_v63  ;;  %v2751_v45 = vpop.f32.mrb[1].mxu1 }
 0x31f   :  { %3417 = vrsqrt.f32 %v1325_v1  ;;  %vm1328_vm1 = vcmp.eq.f32.partialorder %v1325_v1, inf  ;;  %v1331_v49 = vand.u32 2147483648, %v1325_v1  ;;  %vm1330_vm2 = vcmp.eq.f32.partialorder %v1325_v1, 0.0 }
 0x329   :  { %v3418_v46 = vpop.eup %3417 }
 0x32a   :  { %v1327_v53 = vmul.f32 %v3418_v46, %v1325_v1 }
 0x32c   :  { %v1329_v28 = vsel %vm1328_vm1, %v1325_v1, %v1327_v53 }
 0x32d   :  { %v1332_v38 = vsel %vm1330_vm2, %v1331_v49, %v1329_v28 }
 0x32e   :  { %v1333_v24 = vadd.f32 1e-06, %v1332_v38 }
 0x330   :  { %3419 = vrcp.f32 %v1333_v24 }
 0x33a   :  { %v3420_v17 = vpop.eup %3419 }
 0x33b   :  { %v1344_v63 = vmul.f32 %v3420_v17, %v1343_v35 }
 0x33d   :  { %v1352_v45 = vadd.f32 %v2024_v6, %v1344_v63 }
 0x33f   :  { %v4178_v46 = vand.u32 4294901760, %v1352_v45 }
 0x341   :  { %v1458_v1 = vsub.f32 %v1352_v45, %v4178_v46  ;;  %2820 = vmatmul.mubr.f32.vlgmr.msra.gmra.mrb[2].mxu1 %v4178_v46 }
 0x342   :  { %3324 = vmatpush3.bf16.msra.mxu1 %v4019_v48  ;;  %2889 = vmatprep.mubr.msk.f32.mxu1 %vm3423_vm0, %v3424_v4 }
 0x343   :  { %3325 = vmatprep.subr.bf16.mxu1 %v3422_v0  ;;  %v1459_v59 = vand.u32 4294901760, %v1458_v1 }
 0x345   :  { %v1460_v53 = vsub.f32 %v1458_v1, %v1459_v59 }
 0x346   :  { %3327 = vmatpush3.bf16.msra.mxu1 %v4054_v22 }
 0x347   :  { %3328 = vmatprep.subr.bf16.mxu1 %v3422_v0  ;;  %v1461_v49 = vand.u32 4294901760, %v1460_v53 }
 0x349   :  { %2785 = vmatmul.mubr.f32.vlgmr.msra.gmra.mrb[2].mxu0 %v1461_v49 }
 0x34a   :  { %3300 = vmatpush3.bf16.msra.mxu0 %v3299_v18  ;;  %3330 = vmatpush3.bf16.msra.mxu1 %v4083_v21  ;;  %v3347_v18 = vpack.c.bf16 %v1477_v51, %v1470_v50  ;;  %v3362_v50 = vpack.c.bf16 %v1547_v19, %v1540_v14  ;;  %v3365_v51 = vpack.c.bf16 %v1561_v55, %v1554_v42  ;;  %v3421_v14 = vld [vmem:[%s4283_s0] sm:$0xff] }
 0x34b   :  { %3301 = vmatprep.subr.bf16.mxu0 %v3422_v0  ;;  %3331 = vmatprep.subr.bf16.mxu1 %v3422_v0 }
 0x34c   :  { %2854 = vmatprep.mubr.msk.f32.mxu0 %vm3423_vm0, %v3424_v4 }
 0x34e   :  { %3303 = vmatpush3.bf16.msra.mxu0 %v3302_v15  ;;  %3333 = vmatpush3.bf16.msra.mxu1 %v4106_v8 }
 0x34f   :  { %3304 = vmatprep.subr.bf16.mxu0 %v3422_v0  ;;  %3334 = vmatprep.subr.bf16.mxu1 %v3422_v0 }
 0x352   :  { %3306 = vmatpush3.bf16.msra.mxu0 %v3305_v16  ;;  %3336 = vmatpush3.bf16.msra.mxu1 %v4127_v44 }
 0x353   :  { %3307 = vmatprep.subr.bf16.mxu0 %v3422_v0  ;;  %3337 = vmatprep.subr.bf16.mxu1 %v3422_v0 }
 0x356   :  { %3309 = vmatpush3.bf16.msra.mxu0 %v3308_v54  ;;  %3339 = vmatpush3.bf16.msra.mxu1 %v4140_v34 }
 0x357   :  { %3310 = vmatprep.subr.bf16.mxu0 %v3422_v0  ;;  %3340 = vmatprep.subr.bf16.mxu1 %v3422_v0 }
 0x35a   :  { %3312 = vmatpush3.bf16.msra.mxu0 %v3311_v33  ;;  %3342 = vmatpush3.bf16.msra.mxu1 %v4145_v47 }
 0x35b   :  { %3313 = vmatprep.subr.bf16.mxu0 %v3422_v0  ;;  %3343 = vmatprep.subr.bf16.mxu1 %v3422_v0 }
 0x35e   :  { %3315 = vmatpush3.bf16.msra.mxu0 %v3314_v36  ;;  %3345 = vmatpush3.bf16.msra.mxu1 %v4151_v12 }
 0x35f   :  { %3316 = vmatprep.subr.bf16.mxu0 %v3422_v0  ;;  %3370 = vmatprep.subr.bf16.mxu1 %v3422_v0 }
 0x361   :  { %2890 = vmatmul.mubr.f32.vlgmr.msra.gmra.mrb[4].mxu1 %v1459_v59 }
 0x362   :  { %3318 = vmatpush3.bf16.msra.mxu0 %v3317_v11  ;;  %3372 = vmatpush3.bf16.msra.mxu1 %v4019_v48  ;;  %v3350_v48 = vpack.c.bf16 %v1491_v57, %v1484_v41  ;;  %v2025_v57 = vld [vmem:[%s4287_s5] ss:$0 sm:$0xff] }
 0x363   :  { %3319 = vmatprep.subr.bf16.mxu0 %v3422_v0  ;;  %3373 = vmatprep.subr.bf16.mxu1 %v3422_v0 }
 0x364   :  { %2959 = vmatprep.mubr.msk.f32.mxu1 %vm3423_vm0, %v3424_v4 }
 0x366   :  { %3321 = vmatpush3.bf16.msra.mxu0 %v3320_v62  ;;  %3375 = vmatpush3.bf16.msra.mxu1 %v4054_v22 }
 0x367   :  { %3346 = vmatprep.subr.bf16.mxu0 %v3422_v0  ;;  %3376 = vmatprep.subr.bf16.mxu1 %v3422_v0 }
 0x369   :  { %2855 = vmatmul.mubr.f32.vlgmr.msra.gmra.mrb[4].mxu0 %v1458_v1 }
 0x36a   :  { %3348 = vmatpush3.bf16.msra.mxu0 %v3347_v18  ;;  %3378 = vmatpush3.bf16.msra.mxu1 %v4083_v21 }
 0x36b   :  { %3349 = vmatprep.subr.bf16.mxu0 %v3422_v0  ;;  %3379 = vmatprep.subr.bf16.mxu1 %v3422_v0 }
 0x36c   :  { %2924 = vmatprep.mubr.msk.f32.mxu0 %vm3423_vm0, %v3424_v4  ;;  %v3356_v4 = vpack.c.bf16 %v1519_v10, %v1512_v26 }
 0x36e   :  { %3351 = vmatpush3.bf16.msra.mxu0 %v3350_v48  ;;  %3381 = vmatpush3.bf16.msra.mxu1 %v4106_v8 }
 0x36f   :  { %3352 = vmatprep.subr.bf16.mxu0 %v3422_v0  ;;  %3382 = vmatprep.subr.bf16.mxu1 %v3422_v0 }
 0x372   :  { %3354 = vmatpush3.bf16.msra.mxu0 %v3353_v31  ;;  %3384 = vmatpush3.bf16.msra.mxu1 %v4127_v44 }
 0x373   :  { %3355 = vmatprep.subr.bf16.mxu0 %v3422_v0  ;;  %3385 = vmatprep.subr.bf16.mxu1 %v3422_v0 }
 0x376   :  { %3357 = vmatpush3.bf16.msra.mxu0 %v3356_v4  ;;  %3387 = vmatpush3.bf16.msra.mxu1 %v4140_v34 }
 0x377   :  { %3358 = vmatprep.subr.bf16.mxu0 %v3422_v0  ;;  %3388 = vmatprep.subr.bf16.mxu1 %v3422_v0 }
 0x37a   :  { %3360 = vmatpush3.bf16.msra.mxu0 %v3359_v32  ;;  %3390 = vmatpush3.bf16.msra.mxu1 %v4145_v47 }
 0x37b   :  { %3361 = vmatprep.subr.bf16.mxu0 %v3422_v0  ;;  %3391 = vmatprep.subr.bf16.mxu1 %v3422_v0 }
 0x37e   :  { %3363 = vmatpush3.bf16.msra.mxu0 %v3362_v50  ;;  %3393 = vmatpush3.bf16.msra.mxu1 %v4151_v12 }
 0x37f   :  { %3364 = vmatprep.subr.bf16.mxu0 %v3422_v0 }
 0x381   :  { %2960 = vmatmul.mubr.f32.vlgmr.msra.gmra.mrb[6].mxu1 %v4178_v46 }
 0x382   :  { %3366 = vmatpush3.bf16.msra.mxu0 %v3365_v51 }
 0x383   :  { %3367 = vmatprep.subr.bf16.mxu0 %v3422_v0 }
 0x386   :  { %3369 = vmatpush3.bf16.msra.mxu0 %v3368_v29 }
 0x389   :  { %2925 = vmatmul.mubr.f32.vlgmr.msra.gmra.mrb[6].mxu0 %v4178_v46 }
 0x414   :  { %v1614_v30 = vpop.f32.mrb[2].mxu1 }
 0x415   :  { %v2821_v41 = vpop.f32.mrb[3].mxu1 }
 0x41c   :  { %v1463_v39 = vpop.f32.mrb[2].mxu0 }
 0x41d   :  { %v1464_v40 = vadd.f32 %v2025_v57, %v1463_v39  ;;  %v2786_v56 = vpop.f32.mrb[3].mxu0 }
 0x41f   :  { %v1615_v58 = vadd.f32 %v1614_v30, %v1464_v40 }
 0x434   :  { %v1807_v60 = vpop.f32.mrb[4].mxu1 }
 0x435   :  { %v2891_v23 = vpop.f32.mrb[5].mxu1 }
 0x43c   :  { %v1718_v26 = vpop.f32.mrb[4].mxu0 }
 0x43d   :  { %v1719_v10 = vadd.f32 %v1718_v26, %v1615_v58  ;;  %v2856_v52 = vpop.f32.mrb[5].mxu0 }
 0x43f   :  { %v1808_v61 = vadd.f32 %v1807_v60, %v1719_v10 }
 0x454   :  { %v2013_v0 = vpop.f32.mrb[6].mxu1 }
 0x455   :  { %v2961_v3 = vpop.f32.mrb[7].mxu1 }
 0x45c   :  { %v1926_v13 = vpop.f32.mrb[6].mxu0 }
 0x45d   :  { %v1927_v22 = vadd.f32 %v1926_v13, %v1808_v61  ;;  %v2926_v27 = vpop.f32.mrb[7].mxu0 }
 0x45f   :  { %v2014_v37 = vadd.f32 %v2013_v0, %v1927_v22 }
 0x461   :  { %v2017_v19 = vadd.f32 %v3421_v14, %v2014_v37 }
 0x463   :  { %2018 = vst [vmem:[%s4288_s6] sm:$0xff] %v2017_v19 }

</bundles_post_ra>
